<compile_context>
chip_gen: v7x
topology: tpu7x:2x2x1
jax: 0.10.0
libtpu: 0.0.40
codegen_flags: <defaults>
</compile_context>

<pallas_src>
import jax
import jax.numpy as jnp
from jax.experimental import pallas as pl
from jax.experimental.pallas import tpu as pltpu


def _bahdanau_kernel(enc_ref, dec_ref, w1_ref, b1_ref, w2_ref, b2_ref, out_ref):
    """Single grid step covers the whole batch.

    enc_ref/dec_ref: (B, S, H)     w1_ref: (2H, H)     b1_ref/w2_ref: (1, H)
    b2_ref: (1,) f32 in SMEM       out_ref: (2, B, 1, S)  [0]=score, [1]=attn
    """
    B, S, H = enc_ref.shape

    # Upcast inside the kernel (no-op for f32 callers; avoids a wrapper-side
    # HBM round trip if callers hand in bf16).
    enc = enc_ref[...].astype(jnp.float32).reshape(B * S, H)   # (B*S, H)
    dec = dec_ref[...].astype(jnp.float32).reshape(B * S, H)   # (B*S, H)
    w1 = w1_ref[...].astype(jnp.float32)                       # (2H, H)
    b1 = b1_ref[...].astype(jnp.float32)                       # (1, H)

    # Split Linear(2H -> H): rows [0, H) act on encoder features, rows [H, 2H)
    # on decoder features -- exactly equivalent to concat along the feature axis.
    h = jnp.tanh(
        jnp.dot(enc, w1[:H, :], preferred_element_type=jnp.float32)
        + jnp.dot(dec, w1[H:, :], preferred_element_type=jnp.float32)
        + b1
    )                                                          # (B*S, H)

    # v_t: Linear(H -> 1) as a batched contraction over H so the result lands
    # lane-dense with the sequence on lanes: (B,1,H) x (B,S,H) -> (B,1,S).
    h3 = h.reshape(B, S, H)
    w2 = jnp.broadcast_to(
        w2_ref[...].astype(jnp.float32).reshape(1, 1, H), (B, 1, H))
    logits = jnp.einsum("bqh,bkh->bqk", w2, h3,
                        preferred_element_type=jnp.float32) + b2_ref[0]  # (B,1,S)

    # Numerically-stable softmax over the sequence (lane) axis.
    m = jnp.max(logits, axis=-1, keepdims=True)
    e = jnp.exp(logits - m)
    attn = e / jnp.sum(e, axis=-1, keepdims=True)

    # Fused output slab: one writeback instead of two.
    out_ref[0] = logits
    out_ref[1] = attn


@jax.jit
def bahdanau_attention(encoder_hidden_states, decoder_hidden_state, w1, b1, w2, b2):
    """w1: (2H, H) == torch Linear(2H->H).weight.T; w2: (H,) == v_t.weight; b2: (1,)."""
    B, S, H = encoder_hidden_states.shape
    b1_2d = b1.reshape(1, H)
    w2_2d = w2.reshape(1, H)
    b2_1d = b2.reshape(1).astype(jnp.float32)

    out = pl.pallas_call(
        _bahdanau_kernel,
        out_shape=jax.ShapeDtypeStruct((2, B, 1, S), jnp.float32),
        grid=(1,),
        in_specs=[
            pl.BlockSpec((B, S, H), lambda i: (0, 0, 0)),        # encoder states
            pl.BlockSpec((B, S, H), lambda i: (0, 0, 0)),        # decoder states
            pl.BlockSpec((2 * H, H), lambda i: (0, 0)),          # w1
            pl.BlockSpec((1, H), lambda i: (0, 0)),              # b1
            pl.BlockSpec((1, H), lambda i: (0, 0)),              # w2
            pl.BlockSpec(memory_space=pltpu.MemorySpace.SMEM),   # b2 scalar
        ],
        out_specs=pl.BlockSpec((2, B, 1, S), lambda i: (0, 0, 0, 0)),
    )(encoder_hidden_states, decoder_hidden_state, w1, b1_2d, w2_2d, b2_1d)

    # Layout plumbing only: (2, B, 1, S) -> two (B, S) arrays.
    score = out[0].reshape(B, S)
    attn = out[1].reshape(B, S)
    return score, attn


def _reference(encoder_hidden_states, decoder_hidden_state, w1, b1, w2, b2):
    """Pure-JAX reference matching the PyTorch forward semantics."""
    x = jnp.concatenate([encoder_hidden_states, decoder_hidden_state], axis=-1)
    h = jnp.tanh(x @ w1 + b1)                               # (B, S, H)
    score = (h @ w2.reshape(-1, 1)).squeeze(-1) + b2[0]     # (B, S)
    attn = jax.nn.softmax(score, axis=-1)
    return score, attn


if __name__ == "__main__":
    B, S, H = 2, 8, 32

    key = jax.random.PRNGKey(0)
    k_enc, k_dec, k_w1, k_b1, k_w2, k_b2 = jax.random.split(key, 6)

    encoder_hidden_states = jax.random.normal(k_enc, (B, S, H), jnp.float32)
    decoder_hidden_state = jax.random.normal(k_dec, (B, S, H), jnp.float32)

    # Deterministic parameter init mirroring nn.Linear's U(-1/sqrt(fan_in), +)
    lim1 = 1.0 / (2 * H) ** 0.5
    w1 = jax.random.uniform(k_w1, (2 * H, H), jnp.float32, -lim1, lim1)  # Linear(2H->H).weight.T
    b1 = jax.random.uniform(k_b1, (H,), jnp.float32, -lim1, lim1)
    lim2 = 1.0 / H ** 0.5
    w2 = jax.random.uniform(k_w2, (H,), jnp.float32, -lim2, lim2)        # Linear(H->1).weight
    b2 = jax.random.uniform(k_b2, (1,), jnp.float32, -lim2, lim2)

    score, attn = bahdanau_attention(
        encoder_hidden_states, decoder_hidden_state, w1, b1, w2, b2
    )
    jax.block_until_ready((score, attn))

    score_ref, attn_ref = _reference(
        encoder_hidden_states, decoder_hidden_state, w1, b1, w2, b2
    )
    assert score.shape == (B, S) and attn.shape == (B, S)
    assert jnp.allclose(score, score_ref, rtol=1e-4, atol=1e-4)
    assert jnp.allclose(attn, attn_ref, rtol=1e-4, atol=1e-4)
    assert jnp.allclose(jnp.sum(attn, axis=-1), 1.0, atol=1e-5)

    print("KERNEL_OK")
</pallas_src>

<mosaic_0001>
module attributes {stable_mosaic.version = 11 : i64} {
  func.func @_bahdanau_kernel(%arg0: i32, %arg1: memref<2x8x32xf32, #tpu.memory_space<vmem>>, %arg2: memref<2x8x32xf32, #tpu.memory_space<vmem>>, %arg3: memref<64x32xf32, #tpu.memory_space<vmem>>, %arg4: memref<1x32xf32, #tpu.memory_space<vmem>>, %arg5: memref<1x32xf32, #tpu.memory_space<vmem>>, %arg6: memref<1xf32, #tpu.memory_space<smem>>, %arg7: memref<2x2x1x8xf32, #tpu.memory_space<vmem>>) attributes {dimension_semantics = [#tpu.dimension_semantics<arbitrary>], iteration_bounds = array<i64: 1>, scalar_prefetch = 0 : i64, scratch_operands = 0 : i64, tpu.core_type = #tpu.core_type<tc>, window_params = [{pipeline_mode = #tpu.pipeline_mode<synchronous>, transform_indices = @transform_0, window_bounds = array<i64: 2, 8, 32>}, {pipeline_mode = #tpu.pipeline_mode<synchronous>, transform_indices = @transform_1, window_bounds = array<i64: 2, 8, 32>}, {pipeline_mode = #tpu.pipeline_mode<synchronous>, transform_indices = @transform_2, window_bounds = array<i64: 64, 32>}, {pipeline_mode = #tpu.pipeline_mode<synchronous>, transform_indices = @transform_3, window_bounds = array<i64: 1, 32>}, {pipeline_mode = #tpu.pipeline_mode<synchronous>, transform_indices = @transform_4, window_bounds = array<i64: 1, 32>}, {transform_indices = @transform_5, window_bounds = array<i64: 1>}, {pipeline_mode = #tpu.pipeline_mode<synchronous>, transform_indices = @transform_6, window_bounds = array<i64: 2, 2, 1, 8>}]} {
    %c0 = arith.constant 0 : index
    %c0_0 = arith.constant 0 : index
    %c0_1 = arith.constant 0 : index
    %0 = vector.load %arg1[%c0, %c0_0, %c0_1] : memref<2x8x32xf32, #tpu.memory_space<vmem>>, vector<2x8x32xf32>
    %1 = vector.shape_cast %0 : vector<2x8x32xf32> to vector<16x32xf32>
    %c0_2 = arith.constant 0 : index
    %c0_3 = arith.constant 0 : index
    %c0_4 = arith.constant 0 : index
    %2 = vector.load %arg2[%c0_2, %c0_3, %c0_4] : memref<2x8x32xf32, #tpu.memory_space<vmem>>, vector<2x8x32xf32>
    %3 = vector.shape_cast %2 : vector<2x8x32xf32> to vector<16x32xf32>
    %c0_5 = arith.constant 0 : index
    %c0_6 = arith.constant 0 : index
    %4 = vector.load %arg3[%c0_5, %c0_6] : memref<64x32xf32, #tpu.memory_space<vmem>>, vector<64x32xf32>
    %c0_7 = arith.constant 0 : index
    %c0_8 = arith.constant 0 : index
    %5 = vector.load %arg4[%c0_7, %c0_8] : memref<1x32xf32, #tpu.memory_space<vmem>>, vector<1x32xf32>
    %6 = vector.extract_strided_slice %4 {offsets = [0, 0], sizes = [32, 32], strides = [1, 1]} : vector<64x32xf32> to vector<32x32xf32>
    %cst = arith.constant dense<0.000000e+00> : vector<16x32xf32>
    %7 = tpu.matmul %1, %6, %cst {dimension_numbers = #tpu.dot_dimension_numbers<[1], [0], [0], [1], [0, 0, 1, 1], [], []>} : vector<16x32xf32>, vector<32x32xf32>, vector<16x32xf32> -> vector<16x32xf32>
    %8 = vector.extract_strided_slice %4 {offsets = [32, 0], sizes = [32, 32], strides = [1, 1]} : vector<64x32xf32> to vector<32x32xf32>
    %cst_9 = arith.constant dense<0.000000e+00> : vector<16x32xf32>
    %9 = tpu.matmul %3, %8, %cst_9 {dimension_numbers = #tpu.dot_dimension_numbers<[1], [0], [0], [1], [0, 0, 1, 1], [], []>} : vector<16x32xf32>, vector<32x32xf32>, vector<16x32xf32> -> vector<16x32xf32>
    %10 = arith.addf %7, %9 : vector<16x32xf32>
    %11 = vector.broadcast %5 : vector<1x32xf32> to vector<16x32xf32>
    %12 = arith.addf %10, %11 : vector<16x32xf32>
    %13 = math.tanh %12 : vector<16x32xf32>
    %14 = vector.shape_cast %13 : vector<16x32xf32> to vector<2x8x32xf32>
    %c0_10 = arith.constant 0 : index
    %c0_11 = arith.constant 0 : index
    %15 = vector.load %arg5[%c0_10, %c0_11] : memref<1x32xf32, #tpu.memory_space<vmem>>, vector<1x32xf32>
    %16 = vector.shape_cast %15 : vector<1x32xf32> to vector<1x1x32xf32>
    %17 = vector.shape_cast %16 : vector<1x1x32xf32> to vector<1x1x32xf32>
    %18 = vector.broadcast %17 : vector<1x1x32xf32> to vector<2x1x32xf32>
    "tpu.trace_start"() <{level = 10 : i32, message = "bqh,bkh->bqk"}> : () -> ()
    %cst_12 = arith.constant dense<0.000000e+00> : vector<2x1x8xf32>
    %19 = tpu.matmul %18, %14, %cst_12 {dimension_numbers = #tpu.dot_dimension_numbers<[2], [2], [1], [1], [0, 0, 0, 1, 1, 1], [0], [0]>} : vector<2x1x32xf32>, vector<2x8x32xf32>, vector<2x1x8xf32> -> vector<2x1x8xf32>
    "tpu.trace_stop"() : () -> ()
    %c0_13 = arith.constant 0 : index
    %20 = memref.load %arg6[%c0_13] : memref<1xf32, #tpu.memory_space<smem>>
    %21 = vector.broadcast %20 : f32 to vector<2x1x8xf32>
    %22 = arith.addf %19, %21 : vector<2x1x8xf32>
    %cst_14 = arith.constant dense<0xFF800000> : vector<2x1xf32>
    %23 = vector.multi_reduction <maximumf>, %22, %cst_14 [2] : vector<2x1x8xf32> to vector<2x1xf32>
    %24 = vector.shape_cast %23 : vector<2x1xf32> to vector<2x1x1xf32>
    %25 = vector.broadcast %24 : vector<2x1x1xf32> to vector<2x1x8xf32>
    %26 = arith.subf %22, %25 : vector<2x1x8xf32>
    %27 = math.exp %26 : vector<2x1x8xf32>
    %cst_15 = arith.constant dense<0.000000e+00> : vector<2x1xf32>
    %28 = vector.multi_reduction <add>, %27, %cst_15 [2] : vector<2x1x8xf32> to vector<2x1xf32>
    %29 = vector.shape_cast %28 : vector<2x1xf32> to vector<2x1x1xf32>
    %30 = vector.broadcast %29 : vector<2x1x1xf32> to vector<2x1x8xf32>
    %31 = arith.divf %27, %30 : vector<2x1x8xf32>
    %c0_16 = arith.constant 0 : index
    %c0_17 = arith.constant 0 : index
    %c0_18 = arith.constant 0 : index
    %c0_19 = arith.constant 0 : index
    %32 = vector.load %arg7[%c0_16, %c0_17, %c0_18, %c0_19] : memref<2x2x1x8xf32, #tpu.memory_space<vmem>>, vector<1x2x1x8xf32>
    %33 = vector.shape_cast %32 : vector<1x2x1x8xf32> to vector<2x1x8xf32>
    %34 = vector.shape_cast %22 : vector<2x1x8xf32> to vector<1x2x1x8xf32>
    tpu.vector_store %arg7[%c0_16, %c0_17, %c0_18, %c0_19], %34 {strides = array<i32>} : memref<2x2x1x8xf32, #tpu.memory_space<vmem>>, vector<1x2x1x8xf32>,
    %c1 = arith.constant 1 : index
    %c0_20 = arith.constant 0 : index
    %c0_21 = arith.constant 0 : index
    %c0_22 = arith.constant 0 : index
    %35 = vector.load %arg7[%c1, %c0_20, %c0_21, %c0_22] : memref<2x2x1x8xf32, #tpu.memory_space<vmem>>, vector<1x2x1x8xf32>
    %36 = vector.shape_cast %35 : vector<1x2x1x8xf32> to vector<2x1x8xf32>
    %37 = vector.shape_cast %31 : vector<2x1x8xf32> to vector<1x2x1x8xf32>
    tpu.vector_store %arg7[%c1, %c0_20, %c0_21, %c0_22], %37 {strides = array<i32>} : memref<2x2x1x8xf32, #tpu.memory_space<vmem>>, vector<1x2x1x8xf32>,
    return
  }
  func.func @transform_0(%arg0: i32) -> (i32, i32, i32) {
    %c0_i32 = arith.constant 0 : i32
    %c0_i32_0 = arith.constant 0 : i32
    %c0_i32_1 = arith.constant 0 : i32
    %c0_i32_2 = arith.constant 0 : i32
    return %c0_i32, %c0_i32_0, %c0_i32_1 : i32, i32, i32
  }
  func.func @transform_1(%arg0: i32) -> (i32, i32, i32) {
    %c0_i32 = arith.constant 0 : i32
    %c0_i32_0 = arith.constant 0 : i32
    %c0_i32_1 = arith.constant 0 : i32
    %c0_i32_2 = arith.constant 0 : i32
    return %c0_i32, %c0_i32_0, %c0_i32_1 : i32, i32, i32
  }
  func.func @transform_2(%arg0: i32) -> (i32, i32) {
    %c0_i32 = arith.constant 0 : i32
    %c0_i32_0 = arith.constant 0 : i32
    %c0_i32_1 = arith.constant 0 : i32
    return %c0_i32, %c0_i32_0 : i32, i32
  }
  func.func @transform_3(%arg0: i32) -> (i32, i32) {
    %c0_i32 = arith.constant 0 : i32
    %c0_i32_0 = arith.constant 0 : i32
    %c0_i32_1 = arith.constant 0 : i32
    return %c0_i32, %c0_i32_0 : i32, i32
  }
  func.func @transform_4(%arg0: i32) -> (i32, i32) {
    %c0_i32 = arith.constant 0 : i32
    %c0_i32_0 = arith.constant 0 : i32
    %c0_i32_1 = arith.constant 0 : i32
    return %c0_i32, %c0_i32_0 : i32, i32
  }
  func.func @transform_5(%arg0: i32) -> i32 {
    %c0_i32 = arith.constant 0 : i32
    %c0_i32_0 = arith.constant 0 : i32
    return %c0_i32 : i32
  }
  func.func @transform_6(%arg0: i32) -> (i32, i32, i32, i32) {
    %c0_i32 = arith.constant 0 : i32
    %c0_i32_0 = arith.constant 0 : i32
    %c0_i32_1 = arith.constant 0 : i32
    %c0_i32_2 = arith.constant 0 : i32
    %c0_i32_3 = arith.constant 0 : i32
    return %c0_i32, %c0_i32_0, %c0_i32_1, %c0_i32_2 : i32, i32, i32, i32
  }
}

</mosaic_0001>

<bundles_post_ra>
// kernel: bahdanau_attention.1
= control target key start
LH: loop header
LB: loop body
LE: loop exit
PB: predicated region body
PF: predicated region fallthrough
CT: control target
= control target key end

     0   :  { %vm37_vm0 = vcmask 261120   ;;  %v485_v16 = vmov 0.0   ;;  %vm486_vm1 = vmmov 0   ;;  %vm362_vm2 = vcmask 57344   ;;  %s597_s2 = inlined_call_operand.vmem [shape: f32[64,32], index: 2, kind: input, shape index: {}]   ;;  %s598_s1 = inlined_call_operand.vmem [shape: f32[2,8,32], index: 1, kind: input, shape index: {}]   ;;  %s599_s0 = inlined_call_operand.vmem [shape: f32[2,8,32], index: 0, kind: input, shape index: {}]   ;;  %s600_s3 = inlined_call_operand.vmem [shape: f32[1,32], index: 3, kind: input, shape index: {}]   ;;  %s601_s4 = inlined_call_operand.vmem [shape: f32[1,32], index: 4, kind: input, shape index: {}]   ;;  %s602_s5 = inlined_call_operand.<no memory space> [shape: f32[1], index: 5, kind: input, shape index: {}]   ;;  %s603_s6 = inlined_call_operand.vmem [shape: f32[2,2,1,8], index: 6, kind: output, shape index: {}]  }
   0x1   :  { %v32_v0 = vld [vmem:[%s597_s2 + $0x20] sm:$0xff]  ;;  %v33_v1 = vld [vmem:[%s597_s2 + $0x28] sm:$0xff]  ;;  %v34_v2 = vld [vmem:[%s597_s2 + $0x30] sm:$0xff]  ;;  %443 = vmatprep.subr.mxu1 %v485_v16  ;;  %445 = vmatprep.mubr.msk.f32.mxu1 %vm486_vm1, %v485_v16  ;;  %v212_v25 = vstv %s602_s5 }
   0x2   :  { %v453_v3 = vpack.c.bf16 %v33_v1, %v32_v0  ;;  %v35_v4 = vld [vmem:[%s597_s2 + $0x38] sm:$0xff]  ;;  %v26_v5 = vld [vmem:[%s598_s1] sm:$0xff]  ;;  %v29_v8 = vld [vmem:[%s597_s2 + $0x8] sm:$0xff] }
   0x3   :  { %v457_v6 = vpack.c.bf16 %v35_v4, %v34_v2  ;;  %429 = vmatprep.mubr.msk.f32.mxu0 %vm37_vm0, %v26_v5  ;;  %v28_v7 = vld [vmem:[%s597_s2] sm:$0xff]  ;;  %v30_v10 = vld [vmem:[%s597_s2 + $0x10] sm:$0xff]  ;;  %v31_v11 = vld [vmem:[%s597_s2 + $0x18] sm:$0xff] }
   0x4   :  { %454 = vmatprep.subr.bf16.mxu0 %v453_v3  ;;  %v461_v9 = vpack.c.bf16 %v29_v8, %v28_v7  ;;  %v27_v12 = vld [vmem:[%s598_s1 + $0x8] sm:$0xff]  ;;  %v465_v13 = vpack.c.bf16 %v31_v11, %v30_v10  ;;  %v24_v14 = vld [vmem:[%s599_s0] sm:$0xff] }
   0x5   :  { %456 = vmatpush3.bf16.msra.mxu0 %v453_v3  ;;  %v25_v15 = vld [vmem:[%s599_s0 + $0x8] sm:$0xff]  ;;  %v398_v17 = vld [vmem:[%s600_s3] ss:$0 sm:$0xff] }
   0x6   :  { %458 = vmatprep.subr.bf16.mxu0 %v457_v6  ;;  %v210_v23 = vld [vmem:[%s601_s4] sm:$0x1] }
   0x9   :  { %460 = vmatpush3.bf16.msra.mxu0 %v457_v6 }
   0xa   :  { %462 = vmatprep.subr.bf16.mxu0 %v461_v9 }
   0xc   :  { %430 = vmatmul.mubr.msk.f32.vlgmr.msra.gmra.mrb[0].mxu0 %vm37_vm0, %v27_v12 }
   0xd   :  { %464 = vmatpush3.bf16.msra.mxu0 %v461_v9  ;;  %440 = vmatprep.mubr.msk.f32.mxu0 %vm37_vm0, %v24_v14 }
   0xe   :  { %466 = vmatprep.subr.bf16.mxu0 %v465_v13 }
  0x11   :  { %468 = vmatpush3.bf16.msra.mxu0 %v465_v13 }
  0x14   :  { %441 = vmatmul.mubr.msk.f32.vlgmr.msra.gmra.mrb[0].mxu0 %vm37_vm0, %v25_v15 }
  0xe7   :  { %v442_v18 = vpop.f32.mrb[0].mxu0 }
  0xe8   :  { %v191_v19 = vpop.f32.mrb[1].mxu0  ;;  %v207_v21 = vadd.f32 %v442_v18, %v398_v17 }
  0xe9   :  { %v206_v20 = vadd.f32 %v398_v17, %v191_v19 }
  0xeb   :  { %473 = vtanh.f32 %v206_v20 }
  0xec   :  { %475 = vtanh.f32 %v207_v21 }
  0xf5   :  { %v474_v22 = vpop.eup %473 }
  0xf6   :  { %444 = vmatpush3.xpose.msk.msra.mxu1 %vm37_vm0, %v474_v22  ;;  %v476_v24 = vpop.eup %475 }
  0xf7   :  { %448 = vmatprep.subr.mxu1 %v485_v16 }
  0xf9   :  { %446 = vmatmul.mubr.msk.f32.vlgmr.msra.gmra.mrb[0].mxu1 %vm37_vm0, %v210_v23 }
  0xfa   :  { %449 = vmatpush3.xpose.msk.msra.mxu1 %vm37_vm0, %v476_v24  ;;  %450 = vmatprep.mubr.msk.f32.mxu1 %vm486_vm1, %v485_v16 }
  0xfd   :  { %451 = vmatmul.mubr.msk.f32.vlgmr.msra.gmra.mrb[2].mxu1 %vm37_vm0, %v210_v23 }
 0x1cc   :  { %v285_v26 = vpop.f32.mrb[0].mxu1 }
 0x1cd   :  { %v286_v27 = vadd.f32 %v285_v26, %v212_v25  ;;  %v447_v28 = vpop.f32.mrb[1].mxu1 }
 0x1cf   :  { %385 = vst.msk [vmem:[%s603_s6] sm:$0x1] %vm362_vm2, %v286_v27  ;;  %v363_v29 = vsel %vm362_vm2, %v286_v27, -inf }
 0x1d0   :  { %364 = vmax.xlane.f32.xlu0 %v363_v29  ;;  %v358_v30 = vpop.f32.mrb[2].mxu1 }
 0x1d1   :  { %v359_v31 = vadd.f32 %v358_v30, %v212_v25  ;;  %v452_v32 = vpop.f32.mrb[3].mxu1 }
 0x1d3   :  { %386 = vst.msk [vmem:[%s603_s6 + $0x1] sm:$0x1] %vm362_vm2, %v359_v31  ;;  %v366_v33 = vsel %vm362_vm2, %v359_v31, -inf }
 0x1d4   :  { %367 = vmax.xlane.f32.xlu0 %v366_v33 }
 0x25d   :  { %v365_v34 = vpop.xlane.xlu0 %364 }
 0x25e   :  { %v369_v35 = vsub.f32 %v286_v27, %v365_v34 }
 0x260   :  { %v371_v36 = vmul.f32 1.442695, %v369_v35 }
 0x261   :  { %v368_v37 = vpop.xlane.xlu0 %367 }
 0x262   :  { %477 = vpow2.f32 %v371_v36  ;;  %v370_v38 = vsub.f32 %v359_v31, %v368_v37 }
 0x264   :  { %v373_v39 = vmul.f32 1.442695, %v370_v38 }
 0x266   :  { %479 = vpow2.f32 %v373_v39 }
 0x26c   :  { %v478_v40 = vpop.eup %477 }
 0x26d   :  { %v375_v41 = vsel %vm362_vm2, %v478_v40, 0.0 }
 0x26e   :  { %376 = vadd.xlane.f32.xlu1 %v375_v41 }
 0x270   :  { %v480_v42 = vpop.eup %479 }
 0x271   :  { %v378_v43 = vsel %vm362_vm2, %v480_v42, 0.0 }
 0x272   :  { %379 = vadd.xlane.f32.xlu1 %v378_v43 }
 0x2fb   :  { %v377_v44 = vpop.xlane.xlu1 %376 }
 0x2fc   :  { %481 = vrcp.f32 %v377_v44 }
 0x2ff   :  { %v380_v45 = vpop.xlane.xlu1 %379 }
 0x300   :  { %483 = vrcp.f32 %v380_v45 }
 0x306   :  { %v482_v46 = vpop.eup %481 }
 0x307   :  { %v382_v47 = vmul.f32 %v482_v46, %v478_v40 }
 0x309   :  { %403 = vst.msk [vmem:[%s603_s6 + $0x2] sm:$0x1] %vm362_vm2, %v382_v47 }
 0x30a   :  { %v484_v48 = vpop.eup %483 }
 0x30b   :  { %v384_v49 = vmul.f32 %v484_v48, %v480_v42 }
 0x30d   :  { %404 = vst.msk [vmem:[%s603_s6 + $0x3] sm:$0x1] %vm362_vm2, %v384_v49 }

</bundles_post_ra>
